<compile_context>
chip_gen: v7x
topology: tpu7x:2x2x1
jax: 0.10.0
libtpu: 0.0.40
codegen_flags: <defaults>
</compile_context>

<pallas_src>
import jax
import jax.numpy as jnp
from jax import lax
from jax.experimental import pallas as pl
from jax.experimental.pallas import tpu as pltpu


def _images_per_gemm(batch: int) -> int:
    """How many images to fold into one GEMM grid step.

    Single-TensorCore chips (v5e / v6e): fold the whole batch -> one fat (N*OH*OW, K) GEMM,
    fewer grid steps, taller M for the MXU.  Dual-TC chips (v7x, other megacore parts) or
    unknown devices: one image per step so a "parallel" grid keeps both cores busy.
    """
    try:
        kind = jax.devices()[0].device_kind.lower()
    except Exception:
        return 1
    single_tc = any(t in kind for t in ("v5e", "v5 lite", "v5lite", "v6e", "v6 lite", "v6lite"))
    return batch if single_tc else 1


def conv2d_pallas(x_nchw, w_oihw, *, stride=(2, 2), padding=(1, 1)):
    """Conv2d (bias=False) as a fused im2col + GEMM Pallas TPU kernel.

    x: (N, Cin, H, W) NCHW, w: (Cout, Cin, KH, KW). Returns f32 NCHW.

    Specialized to stride 2 (what SimpleNet.conv uses): the padded NHWC input is phase-split
    (even/odd rows and columns) in cheap XLA glue so every in-kernel access is a dense, fully
    static slice.  The (M, K) patch matrix is built in VMEM scratch with one block store per
    kernel tap and consumed immediately by a single bf16 MXU matmul with f32 accumulation.
    """
    N, Cin, H, W = x_nchw.shape
    Cout, Cin_w, KH, KW = w_oihw.shape
    assert Cin == Cin_w
    sh, sw = stride
    pad_h, pad_w = padding
    # TODO(synk): generalize to other strides; SimpleNet only needs stride 2.
    assert (sh, sw) == (2, 2), "kernel specialized for stride 2"
    OH = (H + 2 * pad_h - KH) // sh + 1
    OW = (W + 2 * pad_w - KW) // sw + 1

    # ---------------- XLA glue (~1x input bytes, f32, no cast fusion) ----------------
    # NCHW -> NHWC, zero-pad, stride-2 phase split:
    #   xph[n, ph, pw, i, j, c] = x_padded[n, 2*i + ph, 2*j + pw, c]
    x = jnp.transpose(x_nchw, (0, 2, 3, 1)).astype(jnp.float32)          # (N, H, W, Cin)
    Hp, Wp = H + 2 * pad_h, W + 2 * pad_w
    Hp_e, Wp_e = Hp + (Hp % 2), Wp + (Wp % 2)                            # even for the phase split
    xpad = jnp.pad(
        x, ((0, 0), (pad_h, pad_h + Hp_e - Hp), (pad_w, pad_w + Wp_e - Wp), (0, 0)))
    HI, WI = Hp_e // 2, Wp_e // 2
    xph = xpad.reshape(N, HI, 2, WI, 2, Cin).transpose(0, 2, 4, 1, 3, 5)  # (N,2,2,HI,WI,Cin)
    assert (KH - 1) // 2 + OH <= HI and (KW - 1) // 2 + OW <= WI
    # TODO(synk): the pad + reshape + 6-D transpose pre-pass could be folded into the kernel
    # with strided pl.ds sublane slices + pl.when pad handling to drop one small XLA fusion.

    # weights (Cout,Cin,KH,KW) -> (KH*KW*Cin, Cout) bf16; K ordered (kh, kw, cin) to match
    # the patch-matrix column layout built inside the kernel.
    K = KH * KW * Cin
    wmat = jnp.transpose(w_oihw, (2, 3, 1, 0)).reshape(K, Cout).astype(jnp.bfloat16)

    M_per = OH * OW                 # patch-matrix rows per image
    NB = _images_per_gemm(N)        # images folded into one GEMM grid step
    assert N % NB == 0
    M_blk = NB * M_per              # GEMM M per grid step

    def kernel(xph_ref, w_ref, o_ref, patch_ref):
        # Fused im2col: one block store per (kh, kw) tap -> KH*KW = 9 stores total.
        # All indices are static Python ints; the input lives in f32, so every slice sits on
        # plain 32-bit (8,128) tiles (no packed-bf16 read-modify-write stores).
        for kh in range(KH):
            ph, dh = kh % 2, kh // 2
            for kw in range(KW):
                pw, dw = kw % 2, kw // 2
                tap = kh * KW + kw
                patch_ref[:, :, :, tap * Cin:(tap + 1) * Cin] = (
                    xph_ref[:, ph, pw, dh:dh + OH, dw:dw + OW, :])        # (NB, OH, OW, Cin)

        # One MXU GEMM per grid step: bulk f32->bf16 cast of the LHS (leading-dim merge is
        # layout-preserving since OW=8 fills a sublane tile), f32 accumulation, lane-dense
        # Cout=128 output (unmasked vst).
        lhs = patch_ref[...].reshape(M_blk, K).astype(jnp.bfloat16)
        o_ref[...] = jnp.dot(lhs, w_ref[...], preferred_element_type=jnp.float32)

    out = pl.pallas_call(
        kernel,
        out_shape=jax.ShapeDtypeStruct((N * M_per, Cout), jnp.float32),
        grid_spec=pltpu.PrefetchScalarGridSpec(
            num_scalar_prefetch=0,
            grid=(N // NB,),   # v5e/v6e: 1 fat step; v7x: N parallel steps (one per core)
            in_specs=[
                pl.BlockSpec((NB, 2, 2, HI, WI, Cin),
                             lambda g: (g, 0, 0, 0, 0, 0)),
                pl.BlockSpec((K, Cout), lambda g: (0, 0)),    # weights stay VMEM-resident
            ],
            out_specs=pl.BlockSpec((M_blk, Cout), lambda g: (g, 0)),
            scratch_shapes=[
                pltpu.VMEM((NB, OH, OW, K), jnp.float32),     # im2col patches (VMEM only)
            ],
        ),
        compiler_params=pltpu.CompilerParams(dimension_semantics=("parallel",)),
        cost_estimate=pl.CostEstimate(
            flops=2 * N * M_per * K * Cout,
            transcendentals=0,
            bytes_accessed=(xph.size * 4
                            + wmat.size * wmat.dtype.itemsize
                            + N * M_per * Cout * 4),
        ),
    )(xph, wmat)

    # tiny epilogue back to PyTorch's NCHW convention (kernel output stays lane-dense)
    return jnp.transpose(out.reshape(N, OH, OW, Cout), (0, 3, 1, 2))


class SimpleNet:
    """JAX/Pallas port of the PyTorch SimpleNet (forward only uses self.conv)."""

    def __init__(self, key):
        k1, k2, k3 = jax.random.split(key, 3)
        # deterministic synthetic weights (shapes from the PyTorch __init__)
        self.conv_w = 0.05 * jax.random.normal(k1, (128, 64, 3, 3), dtype=jnp.float32)
        self.conv2_w = 0.05 * jax.random.normal(k2, (128, 64, 3, 3), dtype=jnp.float32)   # unused
        self.conv3_w = 0.05 * jax.random.normal(k3, (128, 128, 3, 3), dtype=jnp.float32)  # unused
        # TODO(synk): torch.ao.quantization MinMax/PerChannel observers + QConfig calibration
        # have no effect on this forward pass and no clean Pallas equivalent; fp path only.

    def forward(self, x, x2):
        # matches torch: return self.conv(x)   (x2, conv2, conv3, relu unused)
        return conv2d_pallas(x, self.conv_w, stride=(2, 2), padding=(1, 1))


if __name__ == "__main__":
    key = jax.random.PRNGKey(0)
    kx, kx2, kw = jax.random.split(key, 3)

    # Cin=64 is fixed by the conv definition; keep batch/spatial small.
    x = jax.random.normal(kx, (2, 64, 16, 16), dtype=jnp.float32)    # NCHW
    x2 = jax.random.normal(kx2, (2, 64, 16, 16), dtype=jnp.float32)  # unused by forward

    net = SimpleNet(kw)
    fwd = jax.jit(net.forward)
    out = jax.block_until_ready(fwd(x, x2))
    assert out.shape == (2, 128, 8, 8), out.shape

    # Apples-to-apples check: XLA conv fed the same bf16 operands, f32 accumulation.
    ref_bf16 = lax.conv_general_dilated(
        x.astype(jnp.bfloat16), net.conv_w.astype(jnp.bfloat16),
        window_strides=(2, 2), padding=((1, 1), (1, 1)),
        dimension_numbers=("NCHW", "OIHW", "NCHW"),
        preferred_element_type=jnp.float32)
    assert jnp.allclose(out, ref_bf16, atol=2e-3, rtol=2e-3), \
        float(jnp.max(jnp.abs(out - ref_bf16)))

    # Sanity vs. the full-f32 conv (looser tolerance: MXU operands are bf16).
    ref_f32 = lax.conv_general_dilated(
        x, net.conv_w, window_strides=(2, 2), padding=((1, 1), (1, 1)),
        dimension_numbers=("NCHW", "OIHW", "NCHW"))
    assert jnp.allclose(out, ref_f32, atol=5e-2, rtol=5e-2), \
        float(jnp.max(jnp.abs(out - ref_f32)))

    print("KERNEL_OK")
</pallas_src>

<mosaic_0001>
module attributes {stable_mosaic.version = 11 : i64} {
  func.func @kernel(%arg0: i32, %arg1: memref<1x2x2x9x9x64xf32, #tpu.memory_space<vmem>>, %arg2: memref<576x128xbf16, #tpu.memory_space<vmem>>, %arg3: memref<64x128xf32, #tpu.memory_space<vmem>>, %arg4: memref<1x8x8x576xf32, #tpu.memory_space<vmem>>) attributes {dimension_semantics = [#tpu.dimension_semantics<parallel>], iteration_bounds = array<i64: 2>, scalar_prefetch = 0 : i64, scratch_operands = 1 : i64, tpu.core_type = #tpu.core_type<tc>, window_params = [{transform_indices = @transform_0, window_bounds = array<i64: 1, 2, 2, 9, 9, 64>}, {pipeline_mode = #tpu.pipeline_mode<synchronous>, transform_indices = @transform_1, window_bounds = array<i64: 576, 128>}, {transform_indices = @transform_2, window_bounds = array<i64: 64, 128>}]} {
    %c0 = arith.constant 0 : index
    %c0_0 = arith.constant 0 : index
    %c0_1 = arith.constant 0 : index
    %c0_2 = arith.constant 0 : index
    %c0_3 = arith.constant 0 : index
    %c0_4 = arith.constant 0 : index
    %0 = vector.load %arg1[%c0, %c0_0, %c0_1, %c0_2, %c0_3, %c0_4] : memref<1x2x2x9x9x64xf32, #tpu.memory_space<vmem>>, vector<1x1x1x8x8x64xf32>
    %1 = vector.shape_cast %0 : vector<1x1x1x8x8x64xf32> to vector<1x8x8x64xf32>
    %c0_5 = arith.constant 0 : index
    %c0_6 = arith.constant 0 : index
    %c0_7 = arith.constant 0 : index
    %c0_8 = arith.constant 0 : index
    %2 = vector.load %arg4[%c0_5, %c0_6, %c0_7, %c0_8] : memref<1x8x8x576xf32, #tpu.memory_space<vmem>>, vector<1x8x8x64xf32>
    tpu.vector_store %arg4[%c0_5, %c0_6, %c0_7, %c0_8], %1 {strides = array<i32>} : memref<1x8x8x576xf32, #tpu.memory_space<vmem>>, vector<1x8x8x64xf32>,
    %c0_9 = arith.constant 0 : index
    %c0_10 = arith.constant 0 : index
    %c1 = arith.constant 1 : index
    %c0_11 = arith.constant 0 : index
    %c0_12 = arith.constant 0 : index
    %c0_13 = arith.constant 0 : index
    %3 = vector.load %arg1[%c0_9, %c0_10, %c1, %c0_11, %c0_12, %c0_13] : memref<1x2x2x9x9x64xf32, #tpu.memory_space<vmem>>, vector<1x1x1x8x8x64xf32>
    %4 = vector.shape_cast %3 : vector<1x1x1x8x8x64xf32> to vector<1x8x8x64xf32>
    %c0_14 = arith.constant 0 : index
    %c0_15 = arith.constant 0 : index
    %c0_16 = arith.constant 0 : index
    %c64 = arith.constant 64 : index
    %5 = vector.load %arg4[%c0_14, %c0_15, %c0_16, %c64] : memref<1x8x8x576xf32, #tpu.memory_space<vmem>>, vector<1x8x8x64xf32>
    tpu.vector_store %arg4[%c0_14, %c0_15, %c0_16, %c64], %4 {strides = array<i32>} : memref<1x8x8x576xf32, #tpu.memory_space<vmem>>, vector<1x8x8x64xf32>,
    %c0_17 = arith.constant 0 : index
    %c0_18 = arith.constant 0 : index
    %c0_19 = arith.constant 0 : index
    %c0_20 = arith.constant 0 : index
    %c1_21 = arith.constant 1 : index
    %c0_22 = arith.constant 0 : index
    %6 = vector.load %arg1[%c0_17, %c0_18, %c0_19, %c0_20, %c1_21, %c0_22] : memref<1x2x2x9x9x64xf32, #tpu.memory_space<vmem>>, vector<1x1x1x8x8x64xf32>
    %7 = vector.shape_cast %6 : vector<1x1x1x8x8x64xf32> to vector<1x8x8x64xf32>
    %c0_23 = arith.constant 0 : index
    %c0_24 = arith.constant 0 : index
    %c0_25 = arith.constant 0 : index
    %c128 = arith.constant 128 : index
    %8 = vector.load %arg4[%c0_23, %c0_24, %c0_25, %c128] : memref<1x8x8x576xf32, #tpu.memory_space<vmem>>, vector<1x8x8x64xf32>
    tpu.vector_store %arg4[%c0_23, %c0_24, %c0_25, %c128], %7 {strides = array<i32>} : memref<1x8x8x576xf32, #tpu.memory_space<vmem>>, vector<1x8x8x64xf32>,
    %c0_26 = arith.constant 0 : index
    %c1_27 = arith.constant 1 : index
    %c0_28 = arith.constant 0 : index
    %c0_29 = arith.constant 0 : index
    %c0_30 = arith.constant 0 : index
    %c0_31 = arith.constant 0 : index
    %9 = vector.load %arg1[%c0_26, %c1_27, %c0_28, %c0_29, %c0_30, %c0_31] : memref<1x2x2x9x9x64xf32, #tpu.memory_space<vmem>>, vector<1x1x1x8x8x64xf32>
    %10 = vector.shape_cast %9 : vector<1x1x1x8x8x64xf32> to vector<1x8x8x64xf32>
    %c0_32 = arith.constant 0 : index
    %c0_33 = arith.constant 0 : index
    %c0_34 = arith.constant 0 : index
    %c192 = arith.constant 192 : index
    %11 = vector.load %arg4[%c0_32, %c0_33, %c0_34, %c192] : memref<1x8x8x576xf32, #tpu.memory_space<vmem>>, vector<1x8x8x64xf32>
    tpu.vector_store %arg4[%c0_32, %c0_33, %c0_34, %c192], %10 {strides = array<i32>} : memref<1x8x8x576xf32, #tpu.memory_space<vmem>>, vector<1x8x8x64xf32>,
    %c0_35 = arith.constant 0 : index
    %c1_36 = arith.constant 1 : index
    %c1_37 = arith.constant 1 : index
    %c0_38 = arith.constant 0 : index
    %c0_39 = arith.constant 0 : index
    %c0_40 = arith.constant 0 : index
    %12 = vector.load %arg1[%c0_35, %c1_36, %c1_37, %c0_38, %c0_39, %c0_40] : memref<1x2x2x9x9x64xf32, #tpu.memory_space<vmem>>, vector<1x1x1x8x8x64xf32>
    %13 = vector.shape_cast %12 : vector<1x1x1x8x8x64xf32> to vector<1x8x8x64xf32>
    %c0_41 = arith.constant 0 : index
    %c0_42 = arith.constant 0 : index
    %c0_43 = arith.constant 0 : index
    %c256 = arith.constant 256 : index
    %14 = vector.load %arg4[%c0_41, %c0_42, %c0_43, %c256] : memref<1x8x8x576xf32, #tpu.memory_space<vmem>>, vector<1x8x8x64xf32>
    tpu.vector_store %arg4[%c0_41, %c0_42, %c0_43, %c256], %13 {strides = array<i32>} : memref<1x8x8x576xf32, #tpu.memory_space<vmem>>, vector<1x8x8x64xf32>,
    %c0_44 = arith.constant 0 : index
    %c1_45 = arith.constant 1 : index
    %c0_46 = arith.constant 0 : index
    %c0_47 = arith.constant 0 : index
    %c1_48 = arith.constant 1 : index
    %c0_49 = arith.constant 0 : index
    %15 = vector.load %arg1[%c0_44, %c1_45, %c0_46, %c0_47, %c1_48, %c0_49] : memref<1x2x2x9x9x64xf32, #tpu.memory_space<vmem>>, vector<1x1x1x8x8x64xf32>
    %16 = vector.shape_cast %15 : vector<1x1x1x8x8x64xf32> to vector<1x8x8x64xf32>
    %c0_50 = arith.constant 0 : index
    %c0_51 = arith.constant 0 : index
    %c0_52 = arith.constant 0 : index
    %c320 = arith.constant 320 : index
    %17 = vector.load %arg4[%c0_50, %c0_51, %c0_52, %c320] : memref<1x8x8x576xf32, #tpu.memory_space<vmem>>, vector<1x8x8x64xf32>
    tpu.vector_store %arg4[%c0_50, %c0_51, %c0_52, %c320], %16 {strides = array<i32>} : memref<1x8x8x576xf32, #tpu.memory_space<vmem>>, vector<1x8x8x64xf32>,
    %c0_53 = arith.constant 0 : index
    %c0_54 = arith.constant 0 : index
    %c0_55 = arith.constant 0 : index
    %c1_56 = arith.constant 1 : index
    %c0_57 = arith.constant 0 : index
    %c0_58 = arith.constant 0 : index
    %18 = vector.load %arg1[%c0_53, %c0_54, %c0_55, %c1_56, %c0_57, %c0_58] : memref<1x2x2x9x9x64xf32, #tpu.memory_space<vmem>>, vector<1x1x1x8x8x64xf32>
    %19 = vector.shape_cast %18 : vector<1x1x1x8x8x64xf32> to vector<1x8x8x64xf32>
    %c0_59 = arith.constant 0 : index
    %c0_60 = arith.constant 0 : index
    %c0_61 = arith.constant 0 : index
    %c384 = arith.constant 384 : index
    %20 = vector.load %arg4[%c0_59, %c0_60, %c0_61, %c384] : memref<1x8x8x576xf32, #tpu.memory_space<vmem>>, vector<1x8x8x64xf32>
    tpu.vector_store %arg4[%c0_59, %c0_60, %c0_61, %c384], %19 {strides = array<i32>} : memref<1x8x8x576xf32, #tpu.memory_space<vmem>>, vector<1x8x8x64xf32>,
    %c0_62 = arith.constant 0 : index
    %c0_63 = arith.constant 0 : index
    %c1_64 = arith.constant 1 : index
    %c1_65 = arith.constant 1 : index
    %c0_66 = arith.constant 0 : index
    %c0_67 = arith.constant 0 : index
    %21 = vector.load %arg1[%c0_62, %c0_63, %c1_64, %c1_65, %c0_66, %c0_67] : memref<1x2x2x9x9x64xf32, #tpu.memory_space<vmem>>, vector<1x1x1x8x8x64xf32>
    %22 = vector.shape_cast %21 : vector<1x1x1x8x8x64xf32> to vector<1x8x8x64xf32>
    %c0_68 = arith.constant 0 : index
    %c0_69 = arith.constant 0 : index
    %c0_70 = arith.constant 0 : index
    %c448 = arith.constant 448 : index
    %23 = vector.load %arg4[%c0_68, %c0_69, %c0_70, %c448] : memref<1x8x8x576xf32, #tpu.memory_space<vmem>>, vector<1x8x8x64xf32>
    tpu.vector_store %arg4[%c0_68, %c0_69, %c0_70, %c448], %22 {strides = array<i32>} : memref<1x8x8x576xf32, #tpu.memory_space<vmem>>, vector<1x8x8x64xf32>,
    %c0_71 = arith.constant 0 : index
    %c0_72 = arith.constant 0 : index
    %c0_73 = arith.constant 0 : index
    %c1_74 = arith.constant 1 : index
    %c1_75 = arith.constant 1 : index
    %c0_76 = arith.constant 0 : index
    %24 = vector.load %arg1[%c0_71, %c0_72, %c0_73, %c1_74, %c1_75, %c0_76] : memref<1x2x2x9x9x64xf32, #tpu.memory_space<vmem>>, vector<1x1x1x8x8x64xf32>
    %25 = vector.shape_cast %24 : vector<1x1x1x8x8x64xf32> to vector<1x8x8x64xf32>
    %c0_77 = arith.constant 0 : index
    %c0_78 = arith.constant 0 : index
    %c0_79 = arith.constant 0 : index
    %c512 = arith.constant 512 : index
    %26 = vector.load %arg4[%c0_77, %c0_78, %c0_79, %c512] : memref<1x8x8x576xf32, #tpu.memory_space<vmem>>, vector<1x8x8x64xf32>
    tpu.vector_store %arg4[%c0_77, %c0_78, %c0_79, %c512], %25 {strides = array<i32>} : memref<1x8x8x576xf32, #tpu.memory_space<vmem>>, vector<1x8x8x64xf32>,
    %c0_80 = arith.constant 0 : index
    %c0_81 = arith.constant 0 : index
    %c0_82 = arith.constant 0 : index
    %c0_83 = arith.constant 0 : index
    %27 = vector.load %arg4[%c0_80, %c0_81, %c0_82, %c0_83] : memref<1x8x8x576xf32, #tpu.memory_space<vmem>>, vector<1x8x8x576xf32>
    %28 = vector.shape_cast %27 : vector<1x8x8x576xf32> to vector<64x576xf32>
    %29 = arith.truncf %28 : vector<64x576xf32> to vector<64x576xbf16>
    %c0_84 = arith.constant 0 : index
    %c0_85 = arith.constant 0 : index
    %30 = vector.load %arg2[%c0_84, %c0_85] : memref<576x128xbf16, #tpu.memory_space<vmem>>, vector<576x128xbf16>
    %cst = arith.constant dense<0.000000e+00> : vector<64x128xf32>
    %31 = tpu.matmul %29, %30, %cst {dimension_numbers = #tpu.dot_dimension_numbers<[1], [0], [0], [1], [0, 0, 1, 1], [], []>} : vector<64x576xbf16>, vector<576x128xbf16>, vector<64x128xf32> -> vector<64x128xf32>
    %c0_86 = arith.constant 0 : index
    %c0_87 = arith.constant 0 : index
    %32 = vector.load %arg3[%c0_86, %c0_87] : memref<64x128xf32, #tpu.memory_space<vmem>>, vector<64x128xf32>
    tpu.vector_store %arg3[%c0_86, %c0_87], %31 {strides = array<i32>} : memref<64x128xf32, #tpu.memory_space<vmem>>, vector<64x128xf32>,
    return
  }
  func.func @transform_0(%arg0: i32) -> (i32, i32, i32, i32, i32, i32) {
    %c0_i32 = arith.constant 0 : i32
    %c0_i32_0 = arith.constant 0 : i32
    %c0_i32_1 = arith.constant 0 : i32
    %c0_i32_2 = arith.constant 0 : i32
    %c0_i32_3 = arith.constant 0 : i32
    %c0_i32_4 = arith.constant 0 : i32
    return %arg0, %c0_i32, %c0_i32_0, %c0_i32_1, %c0_i32_2, %c0_i32_3 : i32, i32, i32, i32, i32, i32
  }
  func.func @transform_1(%arg0: i32) -> (i32, i32) {
    %c0_i32 = arith.constant 0 : i32
    %c0_i32_0 = arith.constant 0 : i32
    %c0_i32_1 = arith.constant 0 : i32
    return %c0_i32, %c0_i32_0 : i32, i32
  }
  func.func @transform_2(%arg0: i32) -> (i32, i32) {
    %c0_i32 = arith.constant 0 : i32
    %c0_i32_0 = arith.constant 0 : i32
    return %arg0, %c0_i32 : i32, i32
  }
}

</mosaic_0001>

<bundles_post_ra>
// kernel: forward.1
= control target key start
LH: loop header
LB: loop body
LE: loop exit
PB: predicated region body
PF: predicated region fallthrough
CT: control target
= control target key end

     0   :  { %7 = vsyncpa [#allocation4], 0  ;;  %s1834_s0 = inlined_call_operand.vmem [shape: f32[2,2,2,9,9,64], index: 0, kind: input, shape index: {}]   ;;  %s1835_s1 = inlined_call_operand.vmem [shape: bf16[576,128], index: 1, kind: input, shape index: {}]   ;;  %s1836_s2 = inlined_call_operand.hbm [shape: f32[128,128], index: 2, kind: output, shape index: {}]  }
   0x1   :  { %9 = vsyncpa [#allocation4 + $0x1], 0  ;;  %s1444_s9 = smov 0   ;;  %s1446_s10 = smov 0  }
   0x2   :  { %s1448_s11 = smov 0   ;;  %s1450_s12 = smov 0  }
   0x3 LB: > { %s1465_s13 = sadd.s32 4294967295, %s1423_s12   ;;  %s1062_s14 = sadd.s32 4294967294, %s1423_s12   ;;  %s1423_s12 = sphi %s1450_s12, %s1842_s12   ;;  %s1419_s11 = sphi %s1448_s11, %s1841_s11   ;;  %s1415_s10 = sphi %s1446_s10, %s1840_s10   ;;  %s1411_s9 = sphi %s1444_s9, %s1839_s9  }
   0x4   : > { %s1469_s15 = sadd.s32 1, %s1423_s12   ;;  %s69_s16 = sadd.s32 1, %s1419_s11 }
   0x5   : > { %s66_s17 = ssub.s32 %s1423_s12, %s1469_s15  ;;  %p79_p0 = scmp.ne.s32.totalorder %s1419_s11, %s1415_s10 }
   0x6   : > { %p67_p1 = scmp.eq.s32.totalorder %s66_s17, 0  ;;  %p80_p2 = scmp.eq.s32.totalorder %s1465_s13, 1 }
   0x7   : > { %p85_p3 = scmp.ne.s32.totalorder %s1415_s10, %s1411_s9  ;;  %p86_p4 = scmp.eq.s32.totalorder %s1062_s14, 1 }
   0x8   : > { %s1480_s18 = scalar_select %p67_p1, %s1419_s11, %s69_s16  }
   0x9   : > { %p1482_p5 = por %p80_p2, %p79_p0  ;;  %p1486_p6 = por %p86_p4, %p85_p3 }
   0xa   : > { %p1065_p7 = scmp.ge.s32.totalorder %s1423_s12, 1  ;;  %p115_p8 = scmp.lt.s32.totalorder %s1423_s12, 3 }
   0xc   : > { %p116_p9 = pnand %p1065_p7, %p115_p8 }
   0xd   : > { %p137_p10 = scmp.lt.s32.totalorder (!%p116_p9), %s1465_s13, 1  ;;  %v1325_v0 = vld [vmem:[%s1835_s1 + $0x40] sm:$0xff] (!%p116_p9)   ;;  %v1327_v2 = vld [vmem:[%s1835_s1 + $0x48] sm:$0xff] (!%p116_p9)   ;;  %s1425_s16 = smov (!%p116_p9), 64   ;;  %v1331_v13 = vld [vmem:[%s1835_s1 + $0x50] sm:$0xff] (!%p116_p9)   ;;  %vm152_vm0 = vcmask (!%p116_p9), 523264  }
   0xe   : > { %119 = sbr.rel (%p116_p9) target bundleno = 453 (0x1c5), region = 28  ;;  %v1326_v1 = vld [vmem:[%s1835_s1] sm:$0xff] (!%p116_p9)   ;;  %1170 = vmatprep.subr.bf16.mxu0 (!%p116_p9), %v1325_v0  ;;  %v1329_v4 = vld [vmem:[%s1835_s1 + $0x8] sm:$0xff] (!%p116_p9)   ;;  %v1333_v15 = vld [vmem:[%s1835_s1 + $0x10] sm:$0xff] (!%p116_p9)   ;;  %vm202_vm1 = vcmask (!%p116_p9), 1048064   ;;  %s134_s27 = sand.u32 (!%p116_p9), 1, %s1415_s10  }
   0xf   : > { %1171 = vmatpush3.bf16.msra.mxu0 (!%p116_p9), %v1326_v1  ;;  %v1328_v3 = vld [vmem:[%s1835_s1 + $0xc0] sm:$0xff] (!%p116_p9)   ;;  %v1332_v14 = vld [vmem:[%s1835_s1 + $0xc8] sm:$0xff] (!%p116_p9)   ;;  %v1335_v19 = vld [vmem:[%s1835_s1 + $0x58] sm:$0xff] (!%p116_p9)   ;;  %s1169_s30 = sshll.u32 (!%p116_p9), %s1465_s13, 10  ;;  %s1426_s14 = smov (!%p116_p9), [#allocation3]  }
  0x10   : > { %1172 = vmatprep.subr.bf16.mxu0 (!%p116_p9), %v1327_v2  ;;  %1210 = vmatprep.subr.bf16.mxu1 (!%p116_p9), %v1328_v3  ;;  %v1330_v5 = vld [vmem:[%s1835_s1 + $0x80] sm:$0xff] (!%p116_p9)   ;;  %v1334_v18 = vld [vmem:[%s1835_s1 + $0x88] sm:$0xff] (!%p116_p9)   ;;  %v1336_v20 = vld [vmem:[%s1835_s1 + $0xd0] sm:$0xff] (!%p116_p9)   ;;  %s1787_s6 = scalar_lea.hbm (!%p116_p9), %s1836_s2, %s1169_s30  ;;  %s1365_s17 = sshll.u32 (!%p116_p9), %s1426_s14, 4  ;;  %s1366_s17 = int_to_ptr.vmem [resolvable:$false] %s1365_s17 }
  0x11   : > { %1211 = vmatpush3.bf16.msra.mxu1 (!%p116_p9), %v1330_v5  ;;  %v1337_v21 = vld [vmem:[%s1835_s1 + $0x18] sm:$0xff] (!%p116_p9)   ;;  %v1338_v24 = vld [vmem:[%s1835_s1 + $0x90] sm:$0xff] (!%p116_p9)   ;;  %v1339_v27 = vld [vmem:[%s1835_s1 + $0x60] sm:$0xff] (!%p116_p9)   ;;  %s1367_s21 = scalar_lea.vmem (!%p116_p9), %s1366_s17, 2048 }
  0x12   : > { %1212 = vmatprep.subr.bf16.mxu1 (!%p116_p9), %v1332_v14  ;;  %v1340_v28 = vld [vmem:[%s1835_s1 + $0xd8] sm:$0xff] (!%p116_p9)   ;;  %v1341_v29 = vld [vmem:[%s1835_s1 + $0x20] sm:$0xff] (!%p116_p9)   ;;  %v1343_v33 = vld [vmem:[%s1835_s1 + $0x68] sm:$0xff] (!%p116_p9)  }
  0x13   : > { %1173 = vmatpush3.bf16.msra.mxu0 (!%p116_p9), %v1329_v4  ;;  %v1342_v30 = vld [vmem:[%s1835_s1 + $0x98] sm:$0xff] (!%p116_p9)   ;;  %v1344_v36 = vld [vmem:[%s1835_s1 + $0xe0] sm:$0xff] (!%p116_p9)   ;;  %v1345_v37 = vld [vmem:[%s1835_s1 + $0x28] sm:$0xff] (!%p116_p9)  }
  0x14   : > { %1174 = vmatprep.subr.bf16.mxu0 (!%p116_p9), %v1331_v13  ;;  %v1346_v38 = vld [vmem:[%s1835_s1 + $0xa0] sm:$0xff] (!%p116_p9)   ;;  %v1347_v42 = vld [vmem:[%s1835_s1 + $0x70] sm:$0xff] (!%p116_p9)   ;;  %v1348_v43 = vld [vmem:[%s1835_s1 + $0xe8] sm:$0xff] (!%p116_p9)  }
  0x15   : > { %s138_s23 = scalar_select %p137_p10, %s1465_s13, 1  ;;  %1213 = vmatpush3.bf16.msra.mxu1 %v1334_v18  ;;  %v1349_v44 = vld [vmem:[%s1835_s1 + $0x30] sm:$0xff]   ;;  %v1350_v45 = vld [vmem:[%s1835_s1 + $0xa8] sm:$0xff]   ;;  %v1351_v50 = vld [vmem:[%s1835_s1 + $0x78] sm:$0xff]  }
  0x16   : > { %1214 = vmatprep.subr.bf16.mxu1 %v1336_v20  ;;  %v1352_v51 = vld [vmem:[%s1835_s1 + $0xf0] sm:$0xff]   ;;  %v1353_v52 = vld [vmem:[%s1835_s1 + $0x38] sm:$0xff]   ;;  %s1793_s13 = scalar_lea.sflag [#allocation4], %s134_s27 }
  0x17   : > { %s1282_s28 = smul.u32 576, %s138_s23  ;;  %1175 = vmatpush3.bf16.msra.mxu0 %v1333_v15  ;;  %v1354_v53 = vld [vmem:[%s1835_s1 + $0xb0] sm:$0xff]   ;;  %v1355_v56 = vld [vmem:[%s1835_s1 + $0xf8] sm:$0xff]  }
  0x18   : > { %1176 = vmatprep.subr.bf16.mxu0 %v1335_v19  ;;  %v1356_v57 = vld [vmem:[%s1835_s1 + $0xb8] sm:$0xff]  }
  0x19   : > { %s1512_s7 = scalar_lea.vmem %s1834_s0, %s1282_s28  ;;  %1215 = vmatpush3.bf16.msra.mxu1 %v1338_v24  ;;  %s1066_s28 = sshll.u32 %s134_s27, 6 }
  0x1a   : > { %v1108_v6 = vld [vmem:[%s1512_s7 + $0xa0] sm:$0xff]  ;;  %v1109_v8 = vld [vmem:[%s1512_s7 + $0xb0] sm:$0xff]  ;;  %1216 = vmatprep.subr.bf16.mxu1 %v1340_v28  ;;  %s136_s29 = scalar_lea.vmem [#allocation3], %s1066_s28 }
  0x1b   : > { %v1076_v7 = vld [vmem:[%s1512_s7 + $0x120] sm:$0xff]  ;;  %375 = vrot.lane.b32.xlu1 %v1108_v6, %s1425_s16  ;;  %v1077_v9 = vld [vmem:[%s1512_s7 + $0x130] sm:$0xff]  ;;  %1177 = vmatpush3.bf16.msra.mxu0 %v1337_v21  ;;  %s1000_s3 = sshll.u32 %s136_s29, 4  ;;  %s1789_s3 = int_to_ptr.vmem [resolvable:$true] %s1000_s3 }
  0x1c   : > { %244 = vrot.lane.b32.xlu0 %v1076_v7, %s1425_s16  ;;  %v1068_v10 = vld [vmem:[%s1512_s7 + $0x90] sm:$0xff]  ;;  %v1092_v12 = vld [vmem:[%s1512_s7 + $0x121] sm:$0xff]  ;;  %1178 = vmatprep.subr.bf16.mxu0 %v1339_v27  ;;  %s1361_s8 = scalar_lea.vmem %s1789_s3, 1024  ;;  %p1368_p0 = scmp.lt.s32.totalorder %s1789_s3, %s1366_s17 }
  0x1d   : > { %v1093_v11 = vld [vmem:[%s1512_s7 + $0x131] sm:$0xff]  ;;  %v1078_v17 = vld [vmem:[%s1512_s7 + $0x140] sm:$0xff]  ;;  %1217 = vmatpush3.bf16.msra.mxu1 %v1342_v30  ;;  %p1362_p11 = scmp.ne.s32.totalorder %s1789_s3, %s1361_s8  ;;  %p1369_p1 = scmp.lt.s32.totalorder %s1367_s21, %s1361_s8 }
  0x1e   : > { %v1079_v16 = vld [vmem:[%s1512_s7 + $0x150] sm:$0xff]  ;;  %v1110_v23 = vld [vmem:[%s1512_s7 + $0xc0] sm:$0xff]  ;;  %1218 = vmatprep.subr.bf16.mxu1 %v1344_v36 }
  0x1f   : > { %377 = vrot.lane.b32.xlu1 %v1109_v8, %s1425_s16  ;;  %v1556_v22 = vld [vmem:[%s1512_s7 + $0xd0] sm:$0xff]  ;;  %v211_v26 = vld [vmem:[%s1512_s7 + $0x1] sm:$0xff]  ;;  %1179 = vmatpush3.bf16.msra.mxu0 %v1341_v29  ;;  %p1363_p12 = pnand %p1362_p11, %p1482_p5  ;;  %p1370_p2 = por %p1369_p1, %p1368_p0 }
  0x20   : > { %246 = vrot.lane.b32.xlu0 %v1077_v9, %s1425_s16  ;;  %v1100_v25 = vld [vmem:[%s1512_s7 + $0x10] sm:$0xff]  ;;  %219 = vst.msk [vmem:[#allocation2 + $0x8] sm:$0xff] %vm152_vm0, %v211_v26  ;;  %v1101_v31 = vld [vmem:[%s1512_s7 + $0x20] sm:$0xff]  ;;  %1180 = vmatprep.subr.bf16.mxu0 %v1343_v33 }
  0x21   : > { %350 = vst.msk [vmem:[#allocation2 + $0x18] sm:$0xff] %vm152_vm0, %v1100_v25  ;;  %154 = vst.msk [vmem:[#allocation2 + $0x28] sm:$0xff] %vm152_vm0, %v1100_v25  ;;  %v212_v32 = vld [vmem:[%s1512_s7 + $0x11] sm:$0xff]  ;;  %v1094_v35 = vld [vmem:[%s1512_s7 + $0x141] sm:$0xff]  ;;  %1219 = vmatpush3.bf16.msra.mxu1 %v1346_v38  ;;  %p1364_p13 = pneg %p1363_p12 }
  0x22   : > { %351 = vst.msk [vmem:[#allocation2 + $0x40] sm:$0xff] %vm152_vm0, %v1101_v31  ;;  %220 = vst.msk [vmem:[#allocation2 + $0x30] sm:$0xff] %vm152_vm0, %v212_v32  ;;  %v1095_v34 = vld [vmem:[%s1512_s7 + $0x151] sm:$0xff]  ;;  %v144_v39 = vld [vmem:[%s1512_s7] sm:$0xff]  ;;  %1220 = vmatprep.subr.bf16.mxu1 %v1348_v43 }
  0x23   : > { %180 = vrot.lane.b32.xlu1 %v1108_v6, %s1425_s16  ;;  %155 = vst.msk [vmem:[#allocation2 + $0x50] sm:$0xff] %vm152_vm0, %v1101_v31  ;;  %415 = vst.msk [vmem:[#allocation2 + $0x20] sm:$0xff] %vm152_vm0, %v212_v32  ;;  %v1081_v40 = vld [vmem:[%s1512_s7 + $0x170] sm:$0xff]  ;;  %v1080_v41 = vld [vmem:[%s1512_s7 + $0x160] sm:$0xff]  ;;  %1181 = vmatpush3.bf16.msra.mxu0 %v1345_v37  ;;  %p1371_p3 = pnand %p1370_p2, %p1364_p13 }
  0x24   : > { %178 = vrot.lane.b32.xlu0 %v1068_v10, %s1425_s16  ;;  %153 = vst.msk [vmem:[#allocation2] sm:$0xff] %vm152_vm0, %v144_v39  ;;  %1182 = vmatprep.subr.bf16.mxu0 %v1347_v42  ;;  %v1625_v46 = vld [vmem:[%s1512_s7 + $0xf0] sm:$0xff]  ;;  %v1112_v47 = vld [vmem:[%s1512_s7 + $0xe0] sm:$0xff]  ;;  %v1358_v39 = vld [vmem:[%s1835_s1 + $0x108] sm:$0xff]  }
  0x25   : > { %v1085_v48 = vld [vmem:[%s1512_s7 + $0x1c0] sm:$0xff]  ;;  %v1084_v49 = vld [vmem:[%s1512_s7 + $0x1b0] sm:$0xff]  ;;  %1221 = vmatpush3.bf16.msra.mxu1 %v1350_v45 }
  0x26   : > { %286 = vst.msk [vmem:[#allocation2 + $0x38] sm:$0xff] %vm152_vm0, %v1085_v48  ;;  %285 = vst.msk [vmem:[#allocation2 + $0x10] sm:$0xff] %vm152_vm0, %v1084_v49  ;;  %1222 = vmatprep.subr.bf16.mxu1 %v1352_v51  ;;  %v214_v54 = vld [vmem:[%s1512_s7 + $0x31] sm:$0xff]  ;;  %v213_v55 = vld [vmem:[%s1512_s7 + $0x21] sm:$0xff] }
  0x27   : > { %311 = vrot.lane.b32.xlu1 %v1093_v11, %s1425_s16  ;;  %1183 = vmatpush3.bf16.msra.mxu0 %v1349_v44  ;;  %222 = vst.msk [vmem:[#allocation2 + $0x80] sm:$0xff] %vm152_vm0, %v214_v54  ;;  %221 = vst.msk [vmem:[#allocation2 + $0x58] sm:$0xff] %vm152_vm0, %v213_v55  ;;  %v1097_v58 = vld [vmem:[%s1512_s7 + $0x171] sm:$0xff]  ;;  %v1096_v59 = vld [vmem:[%s1512_s7 + $0x161] sm:$0xff] }
  0x28   : > { %309 = vrot.lane.b32.xlu0 %v1092_v12, %s1425_s16  ;;  %1184 = vmatprep.subr.bf16.mxu0 %v1351_v50  ;;  %416 = vst.msk [vmem:[#allocation2 + $0x48] sm:$0xff] %vm152_vm0, %v213_v55  ;;  %417 = vst.msk [vmem:[#allocation2 + $0x70] sm:$0xff] %vm152_vm0, %v214_v54  ;;  %v1103_v60 = vld [vmem:[%s1512_s7 + $0x40] sm:$0xff]  ;;  %v1102_v61 = vld [vmem:[%s1512_s7 + $0x30] sm:$0xff] }
  0x29   : > { %1223 = vmatpush3.bf16.msra.mxu1 %v1354_v53  ;;  %v1087_v62 = vld [vmem:[%s1512_s7 + $0x1e0] sm:$0xff]  ;;  %353 = vst.msk [vmem:[#allocation2 + $0x90] sm:$0xff] %vm152_vm0, %v1103_v60  ;;  %352 = vst.msk [vmem:[#allocation2 + $0x68] sm:$0xff] %vm152_vm0, %v1102_v61  ;;  %v1086_v63 = vld [vmem:[%s1512_s7 + $0x1d0] sm:$0xff] }
  0x2a   : > { %1224 = vmatprep.subr.bf16.mxu1 %v1355_v56  ;;  %156 = vst.msk [vmem:[#allocation2 + $0x78] sm:$0xff] %vm152_vm0, %v1102_v61  ;;  %288 = vst.msk [vmem:[#allocation2 + $0x88] sm:$0xff] %vm152_vm0, %v1087_v62  ;;  %v216_v0 = vld [vmem:[%s1512_s7 + $0x51] sm:$0xff]  ;;  %v215_v1 = vld [vmem:[%s1512_s7 + $0x41] sm:$0xff] }
  0x2b   : > { %250 = vrot.lane.b32.xlu1 %v1079_v16, %s1425_s16  ;;  %1185 = vmatpush3.bf16.msra.mxu0 %v1353_v52  ;;  %157 = vst.msk [vmem:[#allocation2 + $0xa0] sm:$0xff] %vm152_vm0, %v1103_v60  ;;  %287 = vst.msk [vmem:[#allocation2 + $0x60] sm:$0xff] %vm152_vm0, %v1086_v63  ;;  %v1105_v2 = vld [vmem:[%s1512_s7 + $0x60] sm:$0xff]  ;;  %v1104_v3 = vld [vmem:[%s1512_s7 + $0x50] sm:$0xff] }
  0x2c   : > { %248 = vrot.lane.b32.xlu0 %v1078_v17, %s1425_s16  ;;  %224 = vst.msk [vmem:[#allocation2 + $0xd0] sm:$0xff] %vm152_vm0, %v216_v0  ;;  %419 = vst.msk [vmem:[#allocation2 + $0xc0] sm:$0xff] %vm152_vm0, %v216_v0  ;;  %v1089_v4 = vld [vmem:[%s1512_s7 + $0x200] sm:$0xff]  ;;  %v1088_v5 = vld [vmem:[%s1512_s7 + $0x1f0] sm:$0xff] }
  0x2d   : > { %1225 = vmatpush3.bf16.msra.mxu1 %v1356_v57  ;;  %223 = vst.msk [vmem:[#allocation2 + $0xa8] sm:$0xff] %vm152_vm0, %v215_v1  ;;  %355 = vst.msk [vmem:[#allocation2 + $0xe0] sm:$0xff] %vm152_vm0, %v1105_v2  ;;  %v1083_v6 = vld [vmem:[%s1512_s7 + $0x190] sm:$0xff]  ;;  %v1082_v7 = vld [vmem:[%s1512_s7 + $0x180] sm:$0xff] }
  0x2e   : > { %354 = vst.msk [vmem:[#allocation2 + $0xb8] sm:$0xff] %vm152_vm0, %v1104_v3  ;;  %158 = vst.msk [vmem:[#allocation2 + $0xc8] sm:$0xff] %vm152_vm0, %v1104_v3  ;;  %v218_v9 = vld [vmem:[%s1512_s7 + $0x71] sm:$0xff]  ;;  %v217_v10 = vld [vmem:[%s1512_s7 + $0x61] sm:$0xff] }
  0x2f   : > { %381 = vrot.lane.b32.xlu1 %v1556_v22, %s1425_s16  ;;  %159 = vst.msk [vmem:[#allocation2 + $0xf0] sm:$0xff] %vm152_vm0, %v1105_v2  ;;  %418 = vst.msk [vmem:[#allocation2 + $0x98] sm:$0xff] %vm152_vm0, %v215_v1  ;;  %v1107_v11 = vld [vmem:[%s1512_s7 + $0x80] sm:$0xff]  ;;  %v1106_v12 = vld [vmem:[%s1512_s7 + $0x70] sm:$0xff] }
  0x30   : > { %379 = vrot.lane.b32.xlu0 %v1110_v23, %s1425_s16  ;;  %290 = vst.msk [vmem:[#allocation2 + $0xd8] sm:$0xff] %vm152_vm0, %v1089_v4  ;;  %289 = vst.msk [vmem:[#allocation2 + $0xb0] sm:$0xff] %vm152_vm0, %v1088_v5  ;;  %v1091_v13 = vld [vmem:[%s1512_s7 + $0x220] sm:$0xff]  ;;  %v1090_v14 = vld [vmem:[%s1512_s7 + $0x210] sm:$0xff] }
  0x31   : > { %226 = vst.msk [vmem:[#allocation2 + $0x120] sm:$0xff] %vm152_vm0, %v218_v9  ;;  %421 = vst.msk [vmem:[#allocation2 + $0x110] sm:$0xff] %vm152_vm0, %v218_v9  ;;  %v1115_v15 = vld [vmem:[%s1512_s7 + $0x110] sm:$0xff]  ;;  %v1114_v16 = vld [vmem:[%s1512_s7 + $0x100] sm:$0xff] }
  0x32   : > { %225 = vst.msk [vmem:[#allocation2 + $0xf8] sm:$0xff] %vm152_vm0, %v217_v10  ;;  %357 = vst.msk [vmem:[#allocation2 + $0x130] sm:$0xff] %vm152_vm0, %v1107_v11  ;;  %v1123_v17 = vld [vmem:[%s1512_s7 + $0x81] sm:$0xff]  ;;  %v1099_v18 = vld [vmem:[%s1512_s7 + $0x191] sm:$0xff] }
  0x33   : > { %184 = vrot.lane.b32.xlu1 %v1110_v23, %s1425_s16  ;;  %420 = vst.msk [vmem:[#allocation2 + $0xe8] sm:$0xff] %vm152_vm0, %v217_v10  ;;  %356 = vst.msk [vmem:[#allocation2 + $0x108] sm:$0xff] %vm152_vm0, %v1106_v12  ;;  %v1098_v19 = vld [vmem:[%s1512_s7 + $0x181] sm:$0xff]  ;;  %v1359_v45 = vld [vmem:[%s1835_s1 + $0x110] sm:$0xff]  }
  0x34   : > { %182 = vrot.lane.b32.xlu0 %v1109_v8, %s1425_s16  ;;  %v1697_v8 = vld [vmem:[%s1835_s1 + $0x100] sm:$0xff]   ;;  %160 = vst.msk [vmem:[#allocation2 + $0x118] sm:$0xff] %vm152_vm0, %v1106_v12  ;;  %292 = vst.msk [vmem:[#allocation2 + $0x128] sm:$0xff] %vm152_vm0, %v1091_v13  ;;  %v1360_v51 = vld [vmem:[%s1835_s1 + $0x118] sm:$0xff]  }
  0x35   : > { %1258 = vmatprep.subr.bf16.mxu0 %v1697_v8  ;;  %1274 = vmatprep.subr.bf16.mxu1 %v1697_v8  ;;  %291 = vst.msk [vmem:[#allocation2 + $0x100] sm:$0xff] %vm152_vm0, %v1090_v14  ;;  %422 = vst.msk [vmem:[#allocation2 + $0x138] sm:$0xff] %vm152_vm0, %v1123_v17 }
  0x37   : > { %315 = vrot.lane.b32.xlu1 %v1095_v34, %s1425_s16 }
  0x38   : > { %313 = vrot.lane.b32.xlu0 %v1094_v35, %s1425_s16 }
  0x3b   : > { %254 = vrot.lane.b32.xlu1 %v1081_v40, %s1425_s16 }
  0x3c   : > { %252 = vrot.lane.b32.xlu0 %v1080_v41, %s1425_s16 }
  0x3f   : > { %385 = vrot.lane.b32.xlu1 %v1625_v46, %s1425_s16 }
  0x40   : > { %383 = vrot.lane.b32.xlu0 %v1112_v47, %s1425_s16 }
  0x43   : > { %188 = vrot.lane.b32.xlu1 %v1112_v47, %s1425_s16 }
  0x44   : > { %186 = vrot.lane.b32.xlu0 %v1556_v22, %s1425_s16 }
  0x47   : > { %319 = vrot.lane.b32.xlu1 %v1097_v58, %s1425_s16 }
  0x48   : > { %317 = vrot.lane.b32.xlu0 %v1096_v59, %s1425_s16 }
  0x4b   : > { %258 = vrot.lane.b32.xlu1 %v1083_v6, %s1425_s16 }
  0x4c   : > { %256 = vrot.lane.b32.xlu0 %v1082_v7, %s1425_s16 }
  0x4f   : > { %389 = vrot.lane.b32.xlu1 %v1115_v15, %s1425_s16 }
  0x50   : > { %387 = vrot.lane.b32.xlu0 %v1114_v16, %s1425_s16 }
  0x53   : > { %192 = vrot.lane.b32.xlu1 %v1114_v16, %s1425_s16 }
  0x54   : > { %190 = vrot.lane.b32.xlu0 %v1625_v46, %s1425_s16 }
  0x57   : > { %323 = vrot.lane.b32.xlu1 %v1099_v18, %s1425_s16 }
  0x58   : > { %321 = vrot.lane.b32.xlu0 %v1098_v19, %s1425_s16 }
  0x8d   : > { %v376_v20 = vpop.permute.xlu1 %375 }
  0x8e   : > { %v245_v21 = vpop.permute.xlu0 %244  ;;  %399 = vst.msk [vmem:[#allocation2 + $0x18] sm:$0xff] %vm202_vm1, %v376_v20 }
  0x8f   : > { %268 = vst.msk [vmem:[#allocation2 + $0x8] sm:$0xff] %vm202_vm1, %v245_v21 }
  0x91   : > { %v378_v22 = vpop.permute.xlu1 %377 }
  0x92   : > { %v247_v23 = vpop.permute.xlu0 %246  ;;  %400 = vst.msk [vmem:[#allocation2 + $0x40] sm:$0xff] %vm202_vm1, %v378_v22 }
  0x93   : > { %269 = vst.msk [vmem:[#allocation2 + $0x30] sm:$0xff] %vm202_vm1, %v247_v23 }
  0x95   : > { %v181_v24 = vpop.permute.xlu1 %180  ;;  %v426_v30 = vld [vmem:[#allocation2 + $0x18] sm:$0xff] }
  0x96   : > { %v179_v25 = vpop.permute.xlu0 %178  ;;  %204 = vst.msk [vmem:[#allocation2 + $0x28] sm:$0xff] %vm202_vm1, %v181_v24  ;;  %v424_v26 = vld [vmem:[#allocation2 + $0x8] sm:$0xff] }
  0x97   : > { %203 = vst.msk [vmem:[#allocation2] sm:$0xff] %vm202_vm1, %v179_v25 }
  0x99   : > { %v312_v27 = vpop.permute.xlu1 %311  ;;  %v431_v31 = vld [vmem:[#allocation2 + $0x40] sm:$0xff] }
  0x9a   : > { %v310_v28 = vpop.permute.xlu0 %309  ;;  %v429_v29 = vld [vmem:[#allocation2 + $0x30] sm:$0xff]  ;;  %334 = vst.msk [vmem:[#allocation2 + $0x38] sm:$0xff] %vm202_vm1, %v312_v27  ;;  %v466_v33 = vpack.c.bf16 %v431_v31, %v426_v30 }
  0x9b   : > { %333 = vst.msk [vmem:[#allocation2 + $0x10] sm:$0xff] %vm202_vm1, %v310_v28  ;;  %v464_v32 = vpack.c.bf16 %v429_v29, %v424_v26 }
  0x9c   : > { %880 = vmatprep.mubr.bf16.mxu1 %v466_v33  ;;  %v427_v33 = vld [vmem:[#allocation2 + $0x20] sm:$0xff] }
  0x9d   : > { %815 = vmatprep.mubr.bf16.mxu0 %v464_v32  ;;  %v251_v34 = vpop.permute.xlu1 %250  ;;  %v428_v37 = vld [vmem:[#allocation2 + $0x28] sm:$0xff] }
  0x9e   : > { %v249_v35 = vpop.permute.xlu0 %248  ;;  %v423_v36 = vld [vmem:[#allocation2] sm:$0xff]  ;;  %271 = vst.msk [vmem:[#allocation2 + $0x80] sm:$0xff] %vm202_vm1, %v251_v34  ;;  %v432_v34 = vld [vmem:[#allocation2 + $0x48] sm:$0xff] }
  0x9f   : > { %270 = vst.msk [vmem:[#allocation2 + $0x58] sm:$0xff] %vm202_vm1, %v249_v35  ;;  %v463_v38 = vpack.c.bf16 %v428_v37, %v423_v36  ;;  %v467_v37 = vpack.c.bf16 %v432_v34, %v427_v33 }
  0xa1   : > { %816 = vmatmul.mubr.bf16.vlgmr.msra.gmra.mrb[0].mxu0 %v463_v38  ;;  %v382_v40 = vpop.permute.xlu1 %381  ;;  %v430_v43 = vld [vmem:[#allocation2 + $0x38] sm:$0xff] }
  0xa2   : > { %v380_v41 = vpop.permute.xlu0 %379  ;;  %v425_v42 = vld [vmem:[#allocation2 + $0x10] sm:$0xff]  ;;  %1259 = vmatpush3.bf16.msra.mxu0 %v1697_v8  ;;  %402 = vst.msk [vmem:[#allocation2 + $0x90] sm:$0xff] %vm202_vm1, %v382_v40  ;;  %v452_v40 = vld [vmem:[#allocation2 + $0xe8] sm:$0xff] }
  0xa3   : > { %401 = vst.msk [vmem:[#allocation2 + $0x68] sm:$0xff] %vm202_vm1, %v380_v41  ;;  %v465_v44 = vpack.c.bf16 %v430_v43, %v425_v42  ;;  %1260 = vmatprep.subr.bf16.mxu0 %v1358_v39  ;;  %v437_v41 = vld [vmem:[#allocation2 + $0x70] sm:$0xff] }
  0xa5   : > { %881 = vmatmul.mubr.bf16.vlgmr.msra.gmra.mrb[0].mxu1 %v465_v44  ;;  %v185_v46 = vpop.permute.xlu1 %184  ;;  %v439_v49 = vld [vmem:[#allocation2 + $0x80] sm:$0xff]  ;;  %v442_v44 = vld [vmem:[#allocation2 + $0x98] sm:$0xff] }
  0xa6   : > { %v183_v47 = vpop.permute.xlu0 %182  ;;  %v434_v48 = vld [vmem:[#allocation2 + $0x58] sm:$0xff]  ;;  %1278 = vmatpush3.bf16.msra.mxu1 %v1697_v8  ;;  %1261 = vmatpush3.bf16.msra.mxu0 %v1358_v39  ;;  %206 = vst.msk [vmem:[#allocation2 + $0x78] sm:$0xff] %vm202_vm1, %v185_v46 }
  0xa7   : > { %205 = vst.msk [vmem:[#allocation2 + $0x50] sm:$0xff] %vm202_vm1, %v183_v47  ;;  %v469_v50 = vpack.c.bf16 %v439_v49, %v434_v48  ;;  %1275 = vmatprep.subr.bf16.mxu1 %v1358_v39  ;;  %1262 = vmatprep.subr.bf16.mxu0 %v1359_v45  ;;  %v472_v47 = vpack.c.bf16 %v442_v44, %v437_v41  ;;  %v457_v48 = vld [vmem:[#allocation2 + $0x110] sm:$0xff]  ;;  %v462_v49 = vld [vmem:[#allocation2 + $0x138] sm:$0xff] }
  0xa9   : > { %823 = vmatprep.mubr.bf16.mxu0 %v469_v50  ;;  %v316_v52 = vpop.permute.xlu1 %315  ;;  %v441_v55 = vld [vmem:[#allocation2 + $0x90] sm:$0xff]  ;;  %v482_v50 = vpack.c.bf16 %v462_v49, %v457_v48 }
  0xaa   : > { %v314_v53 = vpop.permute.xlu0 %313  ;;  %v436_v54 = vld [vmem:[#allocation2 + $0x68] sm:$0xff]  ;;  %1279 = vmatpush3.bf16.msra.mxu1 %v1358_v39  ;;  %1263 = vmatpush3.bf16.msra.mxu0 %v1359_v45  ;;  %336 = vst.msk [vmem:[#allocation2 + $0x88] sm:$0xff] %vm202_vm1, %v316_v52  ;;  %v447_v39 = vld [vmem:[#allocation2 + $0xc0] sm:$0xff] }
  0xab   : > { %335 = vst.msk [vmem:[#allocation2 + $0x60] sm:$0xff] %vm202_vm1, %v314_v53  ;;  %v471_v56 = vpack.c.bf16 %v441_v55, %v436_v54  ;;  %1276 = vmatprep.subr.bf16.mxu1 %v1359_v45  ;;  %1264 = vmatprep.subr.bf16.mxu0 %v1360_v51 }
  0xad   : > { %888 = vmatprep.mubr.bf16.mxu1 %v471_v56  ;;  %v255_v57 = vpop.permute.xlu1 %254  ;;  %v438_v60 = vld [vmem:[#allocation2 + $0x78] sm:$0xff] }
  0xae   : > { %v253_v58 = vpop.permute.xlu0 %252  ;;  %v433_v59 = vld [vmem:[#allocation2 + $0x50] sm:$0xff]  ;;  %1280 = vmatpush3.bf16.msra.mxu1 %v1359_v45  ;;  %1265 = vmatpush3.bf16.msra.mxu0 %v1360_v51  ;;  %273 = vst.msk [vmem:[#allocation2 + $0xd0] sm:$0xff] %vm202_vm1, %v255_v57  ;;  %v477_v45 = vpack.c.bf16 %v452_v40, %v447_v39 }
  0xaf   : > { %272 = vst.msk [vmem:[#allocation2 + $0xa8] sm:$0xff] %vm202_vm1, %v253_v58  ;;  %v468_v61 = vpack.c.bf16 %v438_v60, %v433_v59  ;;  %1277 = vmatprep.subr.bf16.mxu1 %v1360_v51 }
  0xb1   : > { %824 = vmatmul.mubr.bf16.gmra.mrb[4].mxu0 %v468_v61  ;;  %v386_v62 = vpop.permute.xlu1 %385  ;;  %v440_v1 = vld [vmem:[#allocation2 + $0x88] sm:$0xff] }
  0xb2   : > { %v384_v63 = vpop.permute.xlu0 %383  ;;  %v435_v0 = vld [vmem:[#allocation2 + $0x60] sm:$0xff]  ;;  %1281 = vmatpush3.bf16.msra.mxu1 %v1360_v51  ;;  %404 = vst.msk [vmem:[#allocation2 + $0xe0] sm:$0xff] %vm202_vm1, %v386_v62 }
  0xb3   : > { %403 = vst.msk [vmem:[#allocation2 + $0xb8] sm:$0xff] %vm202_vm1, %v384_v63  ;;  %v470_v2 = vpack.c.bf16 %v440_v1, %v435_v0 }
  0xb5   : > { %889 = vmatmul.mubr.bf16.gmra.mrb[4].mxu1 %v470_v2  ;;  %v189_v3 = vpop.permute.xlu1 %188  ;;  %v449_v6 = vld [vmem:[#allocation2 + $0xd0] sm:$0xff] }
  0xb6   : > { %v187_v4 = vpop.permute.xlu0 %186  ;;  %v444_v5 = vld [vmem:[#allocation2 + $0xa8] sm:$0xff]  ;;  %208 = vst.msk [vmem:[#allocation2 + $0xc8] sm:$0xff] %vm202_vm1, %v189_v3 }
  0xb7   : > { %207 = vst.msk [vmem:[#allocation2 + $0xa0] sm:$0xff] %vm202_vm1, %v187_v4  ;;  %v474_v7 = vpack.c.bf16 %v449_v6, %v444_v5 }
  0xb9   : > { %831 = vmatprep.mubr.bf16.mxu0 %v474_v7  ;;  %v320_v8 = vpop.permute.xlu1 %319  ;;  %v451_v11 = vld [vmem:[#allocation2 + $0xe0] sm:$0xff] }
  0xba   : > { %v318_v9 = vpop.permute.xlu0 %317  ;;  %v446_v10 = vld [vmem:[#allocation2 + $0xb8] sm:$0xff]  ;;  %338 = vst.msk [vmem:[#allocation2 + $0xd8] sm:$0xff] %vm202_vm1, %v320_v8 }
  0xbb   : > { %337 = vst.msk [vmem:[#allocation2 + $0xb0] sm:$0xff] %vm202_vm1, %v318_v9  ;;  %v476_v12 = vpack.c.bf16 %v451_v11, %v446_v10 }
  0xbd   : > { %896 = vmatprep.mubr.bf16.mxu1 %v476_v12  ;;  %v259_v13 = vpop.permute.xlu1 %258  ;;  %v448_v16 = vld [vmem:[#allocation2 + $0xc8] sm:$0xff] }
  0xbe   : > { %v257_v14 = vpop.permute.xlu0 %256  ;;  %v443_v15 = vld [vmem:[#allocation2 + $0xa0] sm:$0xff]  ;;  %275 = vst.msk [vmem:[#allocation2 + $0x120] sm:$0xff] %vm202_vm1, %v259_v13 }
  0xbf   : > { %274 = vst.msk [vmem:[#allocation2 + $0xf8] sm:$0xff] %vm202_vm1, %v257_v14  ;;  %v473_v17 = vpack.c.bf16 %v448_v16, %v443_v15 }
  0xc1   : > { %832 = vmatmul.mubr.bf16.gmra.mrb[8].mxu0 %v473_v17  ;;  %v390_v18 = vpop.permute.xlu1 %389  ;;  %v450_v21 = vld [vmem:[#allocation2 + $0xd8] sm:$0xff] }
  0xc2   : > { %v388_v19 = vpop.permute.xlu0 %387  ;;  %v445_v20 = vld [vmem:[#allocation2 + $0xb0] sm:$0xff]  ;;  %406 = vst.msk [vmem:[#allocation2 + $0x130] sm:$0xff] %vm202_vm1, %v390_v18 }
  0xc3   : > { %405 = vst.msk [vmem:[#allocation2 + $0x108] sm:$0xff] %vm202_vm1, %v388_v19  ;;  %v475_v22 = vpack.c.bf16 %v450_v21, %v445_v20 }
  0xc5   : > { %897 = vmatmul.mubr.bf16.gmra.mrb[8].mxu1 %v475_v22  ;;  %v193_v23 = vpop.permute.xlu1 %192  ;;  %v459_v26 = vld [vmem:[#allocation2 + $0x120] sm:$0xff] }
  0xc6   : > { %v191_v24 = vpop.permute.xlu0 %190  ;;  %v454_v25 = vld [vmem:[#allocation2 + $0xf8] sm:$0xff]  ;;  %210 = vst.msk [vmem:[#allocation2 + $0x118] sm:$0xff] %vm202_vm1, %v193_v23 }
  0xc7   : > { %209 = vst.msk [vmem:[#allocation2 + $0xf0] sm:$0xff] %vm202_vm1, %v191_v24  ;;  %v479_v27 = vpack.c.bf16 %v459_v26, %v454_v25 }
  0xc9   : > { %839 = vmatprep.mubr.bf16.mxu0 %v479_v27  ;;  %v324_v28 = vpop.permute.xlu1 %323  ;;  %v461_v31 = vld [vmem:[#allocation2 + $0x130] sm:$0xff] }
  0xca   : > { %v322_v29 = vpop.permute.xlu0 %321  ;;  %v456_v30 = vld [vmem:[#allocation2 + $0x108] sm:$0xff]  ;;  %340 = vst.msk [vmem:[#allocation2 + $0x128] sm:$0xff] %vm202_vm1, %v324_v28 }
  0xcb   : > { %339 = vst.msk [vmem:[#allocation2 + $0x100] sm:$0xff] %vm202_vm1, %v322_v29  ;;  %v481_v32 = vpack.c.bf16 %v461_v31, %v456_v30 }
  0xcd   : > { %904 = vmatprep.mubr.bf16.mxu1 %v481_v32  ;;  %v458_v36 = vld [vmem:[#allocation2 + $0x118] sm:$0xff] }
  0xce   : > { %v453_v35 = vld [vmem:[#allocation2 + $0xf0] sm:$0xff] }
  0xcf   : > { %v478_v38 = vpack.c.bf16 %v458_v36, %v453_v35 }
  0xd1   : > { %840 = vmatmul.mubr.bf16.gmra.mrb[12].mxu0 %v478_v38  ;;  %v460_v43 = vld [vmem:[#allocation2 + $0x128] sm:$0xff] }
  0xd2   : > { %v455_v42 = vld [vmem:[#allocation2 + $0x100] sm:$0xff]  ;;  %1266 = vmatprep.mubr.msk.bf16.mxu0 %vm152_vm0, %v467_v37 }
  0xd3   : > { %v480_v46 = vpack.c.bf16 %v460_v43, %v455_v42 }
  0xd5   : > { %905 = vmatmul.mubr.bf16.gmra.mrb[12].mxu1 %v480_v46 }
  0xd6   : > { %1270 = vmatprep.mubr.msk.bf16.mxu1 %vm152_vm0, %v477_v45 }
  0xd9   : > { %1267 = vmatmul.mubr.msk.bf16.vlgmr.msra.gmra.mrb[16].mxu0 %vm152_vm0, %v472_v47 }
  0xdd   : > { %1271 = vmatmul.mubr.msk.bf16.vlgmr.msra.gmra.mrb[16].mxu1 %vm152_vm0, %v482_v50 }
 0x174   : > { %v1186_v51 = vpop.f32.mrb[0].mxu0 }
 0x175   : > { %v1187_v52 = vpop.f32.mrb[1].mxu0 }
 0x176   : > { %v1188_v53 = vadd.f32 %v1187_v52, %v1186_v51  ;;  %v1189_v54 = vpop.f32.mrb[2].mxu0 }
 0x177   : > { %v1190_v55 = vpop.f32.mrb[3].mxu0 }
 0x178   : > { %v1191_v56 = vadd.f32 %v1190_v55, %v1189_v54  ;;  %v1226_v57 = vpop.f32.mrb[0].mxu1 }
 0x179   : > { %v1227_v58 = vpop.f32.mrb[1].mxu1 }
 0x17a   : > { %v1228_v59 = vadd.f32 %v1227_v58, %v1226_v57  ;;  %v1229_v60 = vpop.f32.mrb[2].mxu1 }
 0x17b   : > { %v1230_v61 = vpop.f32.mrb[3].mxu1 }
 0x17c   : > { %v1231_v62 = vadd.f32 %v1230_v61, %v1229_v60  ;;  %v883_v63 = vadd.f32 %v1228_v59, %v1188_v53 }
 0x17e   : > { %v886_v0 = vadd.f32 %v1231_v62, %v1191_v56 }
 0x184   : > { %v1192_v1 = vpop.f32.mrb[4].mxu0 }
 0x185   : > { %v1193_v2 = vpop.f32.mrb[5].mxu0 }
 0x186   : > { %v1194_v3 = vadd.f32 %v1193_v2, %v1192_v1  ;;  %v1195_v4 = vpop.f32.mrb[6].mxu0 }
 0x187   : > { %v1196_v5 = vpop.f32.mrb[7].mxu0 }
 0x188   : > { %v1197_v6 = vadd.f32 %v1196_v5, %v1195_v4  ;;  %v1232_v7 = vpop.f32.mrb[4].mxu1 }
 0x189   : > { %v1233_v8 = vpop.f32.mrb[5].mxu1 }
 0x18a   : > { %v1234_v9 = vadd.f32 %v1233_v8, %v1232_v7  ;;  %v1235_v10 = vpop.f32.mrb[6].mxu1 }
 0x18b   : > { %v1236_v11 = vpop.f32.mrb[7].mxu1 }
 0x18c   : > { %v1237_v12 = vadd.f32 %v1236_v11, %v1235_v10  ;;  %v891_v13 = vadd.f32 %v1234_v9, %v1194_v3 }
 0x18e   : > { %v894_v14 = vadd.f32 %v1237_v12, %v1197_v6 }
 0x194   : > { %v1198_v15 = vpop.f32.mrb[8].mxu0 }
 0x195   : > { %v1199_v16 = vpop.f32.mrb[9].mxu0 }
 0x196   : > { %v1200_v17 = vadd.f32 %v1199_v16, %v1198_v15  ;;  %v1201_v18 = vpop.f32.mrb[10].mxu0 }
 0x197   : > { %v1202_v19 = vpop.f32.mrb[11].mxu0 }
 0x198   : > { %v1203_v20 = vadd.f32 %v1202_v19, %v1201_v18  ;;  %v1238_v21 = vpop.f32.mrb[8].mxu1 }
 0x199   : > { %v1239_v22 = vpop.f32.mrb[9].mxu1 }
 0x19a   : > { %v1240_v23 = vadd.f32 %v1239_v22, %v1238_v21  ;;  %v1241_v24 = vpop.f32.mrb[10].mxu1 }
 0x19b   : > { %v1242_v25 = vpop.f32.mrb[11].mxu1 }
 0x19c   : > { %v1243_v26 = vadd.f32 %v1242_v25, %v1241_v24  ;;  %v899_v27 = vadd.f32 %v1240_v23, %v1200_v17 }
 0x19e   : > { %v902_v28 = vadd.f32 %v1243_v26, %v1203_v20 }
 0x1a4   : > { %v1204_v29 = vpop.f32.mrb[12].mxu0 }
 0x1a5   : > { %v1205_v30 = vpop.f32.mrb[13].mxu0 }
 0x1a6   : > { %v1206_v31 = vadd.f32 %v1205_v30, %v1204_v29  ;;  %v1207_v32 = vpop.f32.mrb[14].mxu0 }
 0x1a7   : > { %v1208_v33 = vpop.f32.mrb[15].mxu0 }
 0x1a8   : > { %v1209_v34 = vadd.f32 %v1208_v33, %v1207_v32  ;;  %v1244_v35 = vpop.f32.mrb[12].mxu1 }
 0x1a9   : > { %v1245_v36 = vpop.f32.mrb[13].mxu1 }
 0x1aa   : > { %v1246_v37 = vadd.f32 %v1245_v36, %v1244_v35  ;;  %v1247_v38 = vpop.f32.mrb[14].mxu1 }
 0x1ab   : > { %v1248_v39 = vpop.f32.mrb[15].mxu1 }
 0x1ac   : > { %v1249_v40 = vadd.f32 %v1248_v39, %v1247_v38  ;;  %v1268_v41 = vpop.f32.mrb[16].mxu0  ;;  %v907_v42 = vadd.f32 %v1246_v37, %v1206_v31 }
 0x1ad   : > { %v956_v43 = vadd.f32 %v1268_v41, %v891_v13  ;;  %v947_v44 = vpop.f32.mrb[17].mxu0 }
 0x1ae   : > { %v948_v45 = vadd.f32 %v947_v44, %v883_v63  ;;  %v1269_v46 = vpop.f32.mrb[18].mxu0  ;;  %v910_v47 = vadd.f32 %v1249_v40, %v1209_v34 }
 0x1af   : > { %980 = vst [vmem:[%s136_s29 + $0x10] sm:$0xff] %v956_v43  ;;  %v959_v48 = vadd.f32 %v1269_v46, %v894_v14  ;;  %v950_v49 = vpop.f32.mrb[19].mxu0 }
 0x1b0   : > { %978 = vst [vmem:[%s136_s29] sm:$0xff] %v948_v45  ;;  %v951_v50 = vadd.f32 %v950_v49, %v886_v0  ;;  %v1272_v51 = vpop.f32.mrb[16].mxu1 }
 0x1b1   : > { %981 = vst [vmem:[%s136_s29 + $0x18] sm:$0xff] %v959_v48  ;;  %v972_v52 = vadd.f32 %v1272_v51, %v907_v42  ;;  %v963_v53 = vpop.f32.mrb[17].mxu1 }
 0x1b2   : > { %979 = vst [vmem:[%s136_s29 + $0x8] sm:$0xff] %v951_v50  ;;  %v964_v54 = vadd.f32 %v963_v53, %v899_v27  ;;  %v1273_v55 = vpop.f32.mrb[18].mxu1 }
 0x1b3   : > { %984 = vst [vmem:[%s136_s29 + $0x30] sm:$0xff] %v972_v52  ;;  %v975_v56 = vadd.f32 %v1273_v55, %v910_v47  ;;  %v966_v57 = vpop.f32.mrb[19].mxu1 }
 0x1b4   : > { %982 = vst [vmem:[%s136_s29 + $0x20] sm:$0xff] %v964_v54  ;;  %v967_v58 = vadd.f32 %v966_v57, %v902_v28 }
 0x1b5   : > { %985 = vst [vmem:[%s136_s29 + $0x38] sm:$0xff] %v975_v56 }
 0x1b6   : > { %983 = vst [vmem:[%s136_s29 + $0x28] sm:$0xff] %v967_v58 }
 0x1b7   : > { %1374 = shalt.err (!%p1371_p3)
}
 0x1b8   : > { %s1375_s22 = scalar_lea.hbm %s1787_s6, 1024  ;;  %s1379_s23 = scalar_lea.hbm %s1836_s2, 2048 }
 0x1b9   : > { %p1376_p4 = scmp.ne.s32.totalorder %s1787_s6, %s1375_s22  ;;  %p1380_p9 = scmp.lt.u32.totalorder %s1787_s6, %s1836_s2 }
 0x1ba   : > { %p1381_p10 = scmp.lt.u32.totalorder %s1379_s23, %s1375_s22  ;;  %p1383_p12 = scmp.lt.u32.totalorder %s1375_s22, %s1787_s6 }
 0x1bb   : > { %p1377_p7 = pnand %p1376_p4, %p1482_p5 }
 0x1bc   : > { %p1382_p11 = por %p1381_p10, %p1380_p9 }
 0x1bd   : > { %p1378_p8 = pneg %p1377_p7 }
 0x1be   : > { %p1384_p13 = por %p1383_p12, %p1382_p11 }
 0x1c0   : > { %p1385_p0 = pnand %p1384_p13, %p1378_p8 }
 0x1c2   : > { %1388 = shalt.err (!%p1385_p0)
}
 0x1c3   : > { %s1427_s26 = smov 128   ;;  %s1428_s27 = smov 8  }
 0x1c4   : > { %1283 = dma.vmem_to_hbm [thread:$0]  (%p1482_p5), %s1789_s3, 1024, %s1787_s6, %s1793_s13, %s1427_s26, %s1427_s26, %s1428_s27  }
 0x1c5 PF: > { %p1289_p1 = scmp.ge.s32.totalorder %s1423_s12, 2  ;;  %s1015_s28 = sand.u32 1, %s1411_s9  }
 0x1c6   : > { %s1016_s29 = scalar_lea.sflag [#allocation4], %s1015_s28 }
 0x1c7   : > { %p1286_p2 = pnand %p1289_p1, %p1486_p6 }
 0x1c9   : > { %1406 = dma.done.wait (!%p1286_p2), %s1016_s29, 1024  }
 0x1ca   : > { %1408 = vsyncadd (!%p1286_p2), %s1016_s29, 4294966272  ;;  %p12_p3 = scmp.ge.s32.totalorder %s1469_s15, 4   ;;  %s1839_s9 = smov %s1415_s10 }
 0x1cb   : > { %s1840_s10 = smov %s1419_s11  ;;  %s1841_s11 = smov %s1480_s18 }
 0x1cc   : > { %s1842_s12 = smov %s1469_s15  ;;  %14 = sbr.rel (!%p12_p3) target bundleno = 3 (0x3), region = 68 }
 0x1d3   :  { %1021 = vsyncpa [#allocation4], 1 }
 0x1d4   :  { %1023 = vsyncpa [#allocation4 + $0x1], 1 }

</bundles_post_ra>
